<compile_context>
chip_gen: v7x
topology: tpu7x:2x2x1
jax: 0.10.0
libtpu: 0.0.40
codegen_flags: <defaults>
</compile_context>

<pallas_src>
import functools

import jax
import jax.numpy as jnp
from jax.experimental import pallas as pl
from jax.experimental.pallas import tpu as pltpu


def _round_up(a: int, b: int) -> int:
    return (a + b - 1) // b * b


def _invariant_spec(shape):
    """BlockSpec for a grid-invariant operand, single-buffered when supported."""
    idx_map = lambda i: (0,) * len(shape)
    try:
        return pl.BlockSpec(shape, idx_map, pipeline_mode=pl.Buffered(1))
    except (TypeError, AttributeError):
        # Older JAX without pipeline_mode / Buffered: fall back to default buffering.
        return pl.BlockSpec(shape, idx_map)


def ffn_kernel(x_ref, w1_ref, b1_ref, w2_ref, b2_ref, gamma_ref, beta_ref, o_ref,
               *, c_valid: int, c_pad: int):
    # x_ref: (TM, Cp) row tile (Cp = channels padded to a multiple of 128).
    # Weights/biases/LN params are full-size, grid-invariant, resident in VMEM.
    x = x_ref[...].astype(jnp.float32)

    # LayerNorm over the *valid* channels only (eps = 1e-6, matching nn.LayerNorm).
    inv_c = 1.0 / c_valid
    mean = jnp.sum(x, axis=-1, keepdims=True) * inv_c
    if c_valid == c_pad:
        # No padding: centered (numerically nicer) form.
        diff = x - mean
        var = jnp.sum(diff * diff, axis=-1, keepdims=True) * inv_c
    else:
        # Padded lanes of x are zero, so sum(x) / sum(x*x) are already exact over the
        # valid channels; E[x^2] - mean^2 avoids two full-tile masking passes on the VPU.
        var = jnp.sum(x * x, axis=-1, keepdims=True) * inv_c - mean * mean
    xn = (x - mean) * jax.lax.rsqrt(var + 1e-6)
    # Padded gamma/beta lanes are zero, so padded lanes of xn become zero here.
    xn = xn * gamma_ref[...] + beta_ref[...]

    # Dropout == identity in eval mode.

    # lin1 + ReLU: bf16 operands, f32 accumulation on the MXU.
    # (weights stored transposed: y = x @ W^T + b  ->  x @ w1 + b1)
    h = jnp.dot(xn.astype(jnp.bfloat16), w1_ref[...],
                preferred_element_type=jnp.float32) + b1_ref[...]
    h = jnp.maximum(h, 0.0)

    # lin2 + residual (residual re-read from the resident input tile).
    y = jnp.dot(h.astype(jnp.bfloat16), w2_ref[...],
                preferred_element_type=jnp.float32) + b2_ref[...]
    y = y + x

    o_ref[...] = y.astype(o_ref.dtype)


def prepare_ffn_params(w1, b1, w2, b2, gamma, beta):
    """One-time pad + bf16 cast of the parameters (hoisted out of the per-call path).

    w1/w2 are expected already transposed relative to nn.Linear.weight, i.e.
    out = in @ w + b.
    """
    C = w1.shape[0]
    Cp = _round_up(C, 128)
    p = Cp - C
    w1p = jnp.pad(w1, ((0, p), (0, p))).astype(jnp.bfloat16)
    w2p = jnp.pad(w2, ((0, p), (0, p))).astype(jnp.bfloat16)
    b1p = jnp.pad(b1, (0, p)).reshape(1, Cp).astype(jnp.float32)
    b2p = jnp.pad(b2, (0, p)).reshape(1, Cp).astype(jnp.float32)
    gp = jnp.pad(gamma, (0, p)).reshape(1, Cp).astype(jnp.float32)
    bp = jnp.pad(beta, (0, p)).reshape(1, Cp).astype(jnp.float32)
    return w1p, b1p, w2p, b2p, gp, bp


def _vmem_limit_bytes(tm, Cp, act_itemsize):
    """Footprint-based scoped-VMEM request, capped under physical VMEM."""
    tile_bytes = tm * Cp * act_itemsize
    need = (
        2 * tile_bytes                 # x tile, double-buffered
        + 2 * tile_bytes               # out tile, double-buffered
        + 2 * (2 * Cp * Cp * 2)        # bf16 w1+w2 (conservatively assume 2 buffers)
        + 8 * Cp * 4                   # biases / LN params
        + 4 * tm * Cp * 4              # in-kernel f32 temporaries (x, xn, h, y)
    )
    need = int(need * 1.25)            # compiler scratch headroom
    try:
        phys = int(pltpu.get_tpu_info().vmem_capacity_bytes)
    except Exception:
        phys = 64 * 1024 * 1024        # assume the tightest generation (v7x per-TC)
    cap = max(phys - 8 * 1024 * 1024, 32 * 1024 * 1024)
    return min(max(need, 32 * 1024 * 1024), cap)


@functools.partial(jax.jit, static_argnames=("tile_m",))
def ffn_pallas(x, w1p, b1p, w2p, b2p, gp, bp, tile_m=512):
    """x: [B, S, C]; parameters already padded/cast via prepare_ffn_params."""
    B, S, C = x.shape
    M = B * S
    Cp = w1p.shape[0]
    assert Cp == _round_up(C, 128), "params not padded for this channel count"

    # Row tile: large enough to feed the MXU and amortize per-step overhead, but
    # generation-aware (smaller at big C so v7x's 64 MiB VMEM holds everything) and
    # bounded so row-padding waste stays under ~25%.
    tm = tile_m
    if Cp >= 1536:
        tm = min(tm, 256)
    tm = max(8, min(tm, _round_up(M, 8)))
    while tm > 8:
        Mp = _round_up(M, tm)
        if (Mp - M) * 4 <= Mp:          # waste <= 25%
            break
        tm = max(8, tm // 2)
    Mp = _round_up(M, tm)

    x2 = jnp.pad(x.reshape(M, C), ((0, Mp - M), (0, Cp - C)))
    act_itemsize = jnp.dtype(x.dtype).itemsize

    grid = (Mp // tm,)

    cost = pl.CostEstimate(
        flops=4 * Mp * Cp * Cp,                               # two Cp x Cp matmuls
        transcendentals=Mp,                                   # rsqrt per row
        bytes_accessed=2 * Mp * Cp * act_itemsize + 2 * Cp * Cp * 2 + 6 * Cp * 4,
    )

    out = pl.pallas_call(
        functools.partial(ffn_kernel, c_valid=C, c_pad=Cp),
        out_shape=jax.ShapeDtypeStruct((Mp, Cp), x.dtype),
        grid_spec=pl.GridSpec(
            grid=grid,
            in_specs=[
                pl.BlockSpec((tm, Cp), lambda i: (i, 0)),   # x row tile
                _invariant_spec((Cp, Cp)),                  # w1 (single-buffered)
                _invariant_spec((1, Cp)),                   # b1
                _invariant_spec((Cp, Cp)),                  # w2
                _invariant_spec((1, Cp)),                   # b2
                _invariant_spec((1, Cp)),                   # gamma
                _invariant_spec((1, Cp)),                   # beta
            ],
            out_specs=pl.BlockSpec((tm, Cp), lambda i: (i, 0)),
        ),
        compiler_params=pltpu.CompilerParams(
            dimension_semantics=("parallel",),
            vmem_limit_bytes=_vmem_limit_bytes(tm, Cp, act_itemsize),
        ),
        cost_estimate=cost,
    )(x2, w1p, b1p, w2p, b2p, gp, bp)

    return out[:M, :C].reshape(B, S, C)


def ffn_reference(x, w1, b1, w2, b2, gamma, beta):
    """Pure-JAX f32 reference mirroring the PyTorch forward (eval mode)."""
    residual = x
    mean = jnp.mean(x, axis=-1, keepdims=True)
    var = jnp.mean((x - mean) ** 2, axis=-1, keepdims=True)
    xn = (x - mean) / jnp.sqrt(var + 1e-6) * gamma + beta
    h = jax.nn.relu(xn @ w1 + b1)
    return h @ w2 + b2 + residual


if __name__ == "__main__":
    key = jax.random.PRNGKey(0)
    B, S, C = 2, 8, 32

    k_x, k_w1, k_b1, k_w2, k_b2 = jax.random.split(key, 5)

    # Deterministic parameter init (shapes follow nn.Linear(C, C) / nn.LayerNorm(C)).
    bound = 1.0 / jnp.sqrt(C)
    # Store weights already transposed so that out = in @ w + b matches x @ W.T + b.
    w1 = jax.random.uniform(k_w1, (C, C), jnp.float32, -bound, bound)
    b1 = jax.random.uniform(k_b1, (C,), jnp.float32, -bound, bound)
    w2 = jax.random.uniform(k_w2, (C, C), jnp.float32, -bound, bound)
    b2 = jax.random.uniform(k_b2, (C,), jnp.float32, -bound, bound)
    gamma = jnp.ones((C,), jnp.float32)
    beta = jnp.zeros((C,), jnp.float32)

    x = jax.random.normal(k_x, (B, S, C), jnp.float32)

    # One-time parameter preparation (pad + bf16 cast) outside the per-call path.
    params = prepare_ffn_params(w1, b1, w2, b2, gamma, beta)

    out = ffn_pallas(x, *params)
    out = jax.block_until_ready(out)

    ref = ffn_reference(x, w1, b1, w2, b2, gamma, beta)
    assert out.shape == (B, S, C)
    # Tolerance loosened vs pure f32: matmul operands are bf16 (f32 accumulation).
    assert jnp.allclose(out, ref, atol=5e-2, rtol=5e-2), "mismatch vs reference"

    print("KERNEL_OK")
</pallas_src>

<mosaic_0001>
module attributes {stable_mosaic.version = 11 : i64} {
  func.func @ffn_kernel(%arg0: i32, %arg1: memref<16x128xf32, #tpu.memory_space<vmem>>, %arg2: memref<128x128xbf16, #tpu.memory_space<vmem>>, %arg3: memref<1x128xf32, #tpu.memory_space<vmem>>, %arg4: memref<128x128xbf16, #tpu.memory_space<vmem>>, %arg5: memref<1x128xf32, #tpu.memory_space<vmem>>, %arg6: memref<1x128xf32, #tpu.memory_space<vmem>>, %arg7: memref<1x128xf32, #tpu.memory_space<vmem>>, %arg8: memref<16x128xf32, #tpu.memory_space<vmem>>) attributes {dimension_semantics = [#tpu.dimension_semantics<parallel>], iteration_bounds = array<i64: 1>, scalar_prefetch = 0 : i64, scratch_operands = 0 : i64, tpu.core_type = #tpu.core_type<tc>, window_params = [{transform_indices = @transform_0, window_bounds = array<i64: 16, 128>}, {pipeline_mode = #tpu.pipeline_mode<synchronous>, transform_indices = @transform_1, window_bounds = array<i64: 128, 128>}, {pipeline_mode = #tpu.pipeline_mode<synchronous>, transform_indices = @transform_2, window_bounds = array<i64: 1, 128>}, {pipeline_mode = #tpu.pipeline_mode<synchronous>, transform_indices = @transform_3, window_bounds = array<i64: 128, 128>}, {pipeline_mode = #tpu.pipeline_mode<synchronous>, transform_indices = @transform_4, window_bounds = array<i64: 1, 128>}, {pipeline_mode = #tpu.pipeline_mode<synchronous>, transform_indices = @transform_5, window_bounds = array<i64: 1, 128>}, {pipeline_mode = #tpu.pipeline_mode<synchronous>, transform_indices = @transform_6, window_bounds = array<i64: 1, 128>}, {transform_indices = @transform_7, window_bounds = array<i64: 16, 128>}]} {
    %c0 = arith.constant 0 : index
    %c0_0 = arith.constant 0 : index
    %0 = vector.load %arg1[%c0, %c0_0] : memref<16x128xf32, #tpu.memory_space<vmem>>, vector<16x128xf32>
    %cst = arith.constant dense<0.000000e+00> : vector<16xf32>
    %1 = vector.multi_reduction <add>, %0, %cst [1] : vector<16x128xf32> to vector<16xf32>
    %2 = vector.shape_cast %1 : vector<16xf32> to vector<16x1xf32>
    %cst_1 = arith.constant 3.125000e-02 : f32
    %3 = vector.broadcast %cst_1 : f32 to vector<16x1xf32>
    %4 = arith.mulf %2, %3 : vector<16x1xf32>
    %5 = arith.mulf %0, %0 : vector<16x128xf32>
    %cst_2 = arith.constant dense<0.000000e+00> : vector<16xf32>
    %6 = vector.multi_reduction <add>, %5, %cst_2 [1] : vector<16x128xf32> to vector<16xf32>
    %7 = vector.shape_cast %6 : vector<16xf32> to vector<16x1xf32>
    %cst_3 = arith.constant 3.125000e-02 : f32
    %8 = vector.broadcast %cst_3 : f32 to vector<16x1xf32>
    %9 = arith.mulf %7, %8 : vector<16x1xf32>
    %10 = arith.mulf %4, %4 : vector<16x1xf32>
    %11 = arith.subf %9, %10 : vector<16x1xf32>
    %12 = vector.broadcast %4 : vector<16x1xf32> to vector<16x128xf32>
    %13 = arith.subf %0, %12 : vector<16x128xf32>
    %cst_4 = arith.constant 9.99999997E-7 : f32
    %14 = vector.broadcast %cst_4 : f32 to vector<16x1xf32>
    %15 = arith.addf %11, %14 : vector<16x1xf32>
    %16 = math.rsqrt %15 : vector<16x1xf32>
    %17 = vector.broadcast %16 : vector<16x1xf32> to vector<16x128xf32>
    %18 = arith.mulf %13, %17 : vector<16x128xf32>
    %c0_5 = arith.constant 0 : index
    %c0_6 = arith.constant 0 : index
    %19 = vector.load %arg6[%c0_5, %c0_6] : memref<1x128xf32, #tpu.memory_space<vmem>>, vector<1x128xf32>
    %20 = vector.broadcast %19 : vector<1x128xf32> to vector<16x128xf32>
    %21 = arith.mulf %18, %20 : vector<16x128xf32>
    %c0_7 = arith.constant 0 : index
    %c0_8 = arith.constant 0 : index
    %22 = vector.load %arg7[%c0_7, %c0_8] : memref<1x128xf32, #tpu.memory_space<vmem>>, vector<1x128xf32>
    %23 = vector.broadcast %22 : vector<1x128xf32> to vector<16x128xf32>
    %24 = arith.addf %21, %23 : vector<16x128xf32>
    %25 = arith.truncf %24 : vector<16x128xf32> to vector<16x128xbf16>
    %c0_9 = arith.constant 0 : index
    %c0_10 = arith.constant 0 : index
    %26 = vector.load %arg2[%c0_9, %c0_10] : memref<128x128xbf16, #tpu.memory_space<vmem>>, vector<128x128xbf16>
    %cst_11 = arith.constant dense<0.000000e+00> : vector<16x128xf32>
    %27 = tpu.matmul %25, %26, %cst_11 {dimension_numbers = #tpu.dot_dimension_numbers<[1], [0], [0], [1], [0, 0, 1, 1], [], []>} : vector<16x128xbf16>, vector<128x128xbf16>, vector<16x128xf32> -> vector<16x128xf32>
    %c0_12 = arith.constant 0 : index
    %c0_13 = arith.constant 0 : index
    %28 = vector.load %arg3[%c0_12, %c0_13] : memref<1x128xf32, #tpu.memory_space<vmem>>, vector<1x128xf32>
    %29 = vector.broadcast %28 : vector<1x128xf32> to vector<16x128xf32>
    %30 = arith.addf %27, %29 : vector<16x128xf32>
    %cst_14 = arith.constant 0.000000e+00 : f32
    %31 = vector.broadcast %cst_14 : f32 to vector<16x128xf32>
    %32 = arith.maximumf %30, %31 : vector<16x128xf32>
    %33 = arith.truncf %32 : vector<16x128xf32> to vector<16x128xbf16>
    %c0_15 = arith.constant 0 : index
    %c0_16 = arith.constant 0 : index
    %34 = vector.load %arg4[%c0_15, %c0_16] : memref<128x128xbf16, #tpu.memory_space<vmem>>, vector<128x128xbf16>
    %cst_17 = arith.constant dense<0.000000e+00> : vector<16x128xf32>
    %35 = tpu.matmul %33, %34, %cst_17 {dimension_numbers = #tpu.dot_dimension_numbers<[1], [0], [0], [1], [0, 0, 1, 1], [], []>} : vector<16x128xbf16>, vector<128x128xbf16>, vector<16x128xf32> -> vector<16x128xf32>
    %c0_18 = arith.constant 0 : index
    %c0_19 = arith.constant 0 : index
    %36 = vector.load %arg5[%c0_18, %c0_19] : memref<1x128xf32, #tpu.memory_space<vmem>>, vector<1x128xf32>
    %37 = vector.broadcast %36 : vector<1x128xf32> to vector<16x128xf32>
    %38 = arith.addf %35, %37 : vector<16x128xf32>
    %39 = arith.addf %38, %0 : vector<16x128xf32>
    %c0_20 = arith.constant 0 : index
    %c0_21 = arith.constant 0 : index
    %40 = vector.load %arg8[%c0_20, %c0_21] : memref<16x128xf32, #tpu.memory_space<vmem>>, vector<16x128xf32>
    tpu.vector_store %arg8[%c0_20, %c0_21], %39 {strides = array<i32>} : memref<16x128xf32, #tpu.memory_space<vmem>>, vector<16x128xf32>,
    return
  }
  func.func @transform_0(%arg0: i32) -> (i32, i32) {
    %c0_i32 = arith.constant 0 : i32
    %c0_i32_0 = arith.constant 0 : i32
    return %arg0, %c0_i32 : i32, i32
  }
  func.func @transform_1(%arg0: i32) -> (i32, i32) {
    %c0_i32 = arith.constant 0 : i32
    %c0_i32_0 = arith.constant 0 : i32
    %c0_i32_1 = arith.constant 0 : i32
    return %c0_i32, %c0_i32_0 : i32, i32
  }
  func.func @transform_2(%arg0: i32) -> (i32, i32) {
    %c0_i32 = arith.constant 0 : i32
    %c0_i32_0 = arith.constant 0 : i32
    %c0_i32_1 = arith.constant 0 : i32
    return %c0_i32, %c0_i32_0 : i32, i32
  }
  func.func @transform_3(%arg0: i32) -> (i32, i32) {
    %c0_i32 = arith.constant 0 : i32
    %c0_i32_0 = arith.constant 0 : i32
    %c0_i32_1 = arith.constant 0 : i32
    return %c0_i32, %c0_i32_0 : i32, i32
  }
  func.func @transform_4(%arg0: i32) -> (i32, i32) {
    %c0_i32 = arith.constant 0 : i32
    %c0_i32_0 = arith.constant 0 : i32
    %c0_i32_1 = arith.constant 0 : i32
    return %c0_i32, %c0_i32_0 : i32, i32
  }
  func.func @transform_5(%arg0: i32) -> (i32, i32) {
    %c0_i32 = arith.constant 0 : i32
    %c0_i32_0 = arith.constant 0 : i32
    %c0_i32_1 = arith.constant 0 : i32
    return %c0_i32, %c0_i32_0 : i32, i32
  }
  func.func @transform_6(%arg0: i32) -> (i32, i32) {
    %c0_i32 = arith.constant 0 : i32
    %c0_i32_0 = arith.constant 0 : i32
    %c0_i32_1 = arith.constant 0 : i32
    return %c0_i32, %c0_i32_0 : i32, i32
  }
  func.func @transform_7(%arg0: i32) -> (i32, i32) {
    %c0_i32 = arith.constant 0 : i32
    %c0_i32_0 = arith.constant 0 : i32
    return %arg0, %c0_i32 : i32, i32
  }
}

</mosaic_0001>

<bundles_post_ra>
// kernel: ffn_pallas.1
= control target key start
LH: loop header
LB: loop body
LE: loop exit
PB: predicated region body
PF: predicated region fallthrough
CT: control target
= control target key end

     0   :  { %12 = vsyncpa [#allocation3], 0  ;;  %s617_s0 = inlined_call_operand.vmem [shape: f32[16,128], index: 0, kind: input, shape index: {}]   ;;  %s618_s1 = inlined_call_operand.hbm [shape: bf16[128,128], index: 1, kind: input, shape index: {}]   ;;  %s619_s2 = inlined_call_operand.vmem [shape: f32[1,128], index: 2, kind: input, shape index: {}]   ;;  %s620_s3 = inlined_call_operand.hbm [shape: bf16[128,128], index: 3, kind: input, shape index: {}]   ;;  %s621_s4 = inlined_call_operand.vmem [shape: f32[1,128], index: 4, kind: input, shape index: {}]   ;;  %s622_s5 = inlined_call_operand.vmem [shape: f32[1,128], index: 5, kind: input, shape index: {}]   ;;  %s623_s6 = inlined_call_operand.vmem [shape: f32[1,128], index: 6, kind: input, shape index: {}]   ;;  %s624_s7 = inlined_call_operand.vmem [shape: f32[16,128], index: 7, kind: output, shape index: {}]  }
   0x1   :  { %13 = vsyncpa [#allocation5], 0  ;;  %s491_s24 = smov [#allocation2]   ;;  %s443_s28 = scalar_lea.hbm %s618_s1, 1024 }
   0x2   :  { %s21_s25 = sshll.u32 %s491_s24, 4  ;;  %p444_p0 = scmp.ne.s32.totalorder %s618_s1, %s443_s28  ;;  %s22_s25 = int_to_ptr.vmem [resolvable:$true] %s21_s25 }
   0x3   :  { %p447_p1 = scmp.lt.u32.totalorder %s443_s28, %s618_s1 }
   0x5   :  { %p449_p2 = pnand %p447_p1, %p444_p0 }
   0x7   :  { %452 = shalt.err (!%p449_p2)
}
   0x8   :  { %s453_s10 = scalar_lea.vmem %s22_s25, 1024  ;;  %p458_p4 = scmp.lt.s32.totalorder %s22_s25, %s22_s25 }
   0x9   :  { %p454_p3 = scmp.ne.s32.totalorder %s22_s25, %s453_s10  ;;  %p459_p5 = scmp.lt.s32.totalorder %s453_s10, %s453_s10 }
   0xb   :  { %p460_p6 = por %p459_p5, %p458_p4 }
   0xd   :  { %p461_p7 = pnand %p460_p6, %p454_p3 }
   0xf   :  { %464 = shalt.err (!%p461_p7)
}
  0x10   :  { %s492_s11 = smov 64   ;;  %s493_s12 = smov 4  }
  0x11   :  { %27 = dma.hbm_to_vmem [thread:$0]  %s618_s1, 1024, %s22_s25, [#allocation3], %s492_s11, %s492_s11, %s493_s12  }
  0x12   :  { %s494_s15 = smov [#allocation4]   ;;  %s465_s19 = scalar_lea.hbm %s620_s3, 1024 }
  0x13   :  { %s35_s16 = sshll.u32 %s494_s15, 4  ;;  %p466_p8 = scmp.ne.s32.totalorder %s620_s3, %s465_s19  ;;  %s36_s16 = int_to_ptr.vmem [resolvable:$true] %s35_s16 }
  0x14   :  { %p469_p9 = scmp.lt.u32.totalorder %s465_s19, %s620_s3 }
  0x16   :  { %p471_p10 = pnand %p469_p9, %p466_p8 }
  0x18   :  { %474 = shalt.err (!%p471_p10)
}
  0x19   :  { %s475_s24 = scalar_lea.vmem %s36_s16, 1024  ;;  %p480_p12 = scmp.lt.s32.totalorder %s36_s16, %s36_s16 }
  0x1a   :  { %p476_p11 = scmp.ne.s32.totalorder %s36_s16, %s475_s24  ;;  %p481_p13 = scmp.lt.s32.totalorder %s475_s24, %s475_s24 }
  0x1c   :  { %p482_p0 = por %p481_p13, %p480_p12 }
  0x1e   :  { %p483_p1 = pnand %p482_p0, %p476_p11 }
  0x20   :  { %486 = shalt.err (!%p483_p1)
}
  0x21   :  { %41 = dma.hbm_to_vmem [thread:$0]  %s620_s3, 1024, %s36_s16, [#allocation5], %s492_s11, %s492_s11, %s493_s12  }
  0x22   :  { %487 = dma.done.wait [#allocation3], 1024  }
  0x23   :  { %488 = vsyncadd [#allocation3], 4294966272 }
  0x24   :  { %489 = dma.done.wait [#allocation5], 1024  }
  0x25   :  { %490 = vsyncadd [#allocation5], 4294966272  ;;  %v495_v0 = vmov 0.0   ;;  %v566_v1 = vld [vmem:[%s617_s0] sm:$0xff]  ;;  %v571_v2 = vld [vmem:[%s617_s0 + $0x8] sm:$0xff]  ;;  %vm496_vm0 = vmmov 0  }
  0x26   :  { %377 = vmatprep.subr.bf16.mxu0 %v495_v0  ;;  %397 = vmatprep.subr.bf16.mxu1 %v495_v0  ;;  %v63_v3 = vmul.f32 %v566_v1, %v566_v1  ;;  %v64_v4 = vmul.f32 %v571_v2, %v571_v2  ;;  %v423_v5 = vld [vmem:[#allocation2] sm:$0xff]   ;;  %v424_v6 = vld [vmem:[#allocation2 + $0x8] sm:$0xff]   ;;  %v425_v7 = vld [vmem:[#allocation2 + $0x10] sm:$0xff]  }
  0x27   :  { %57 = vadd.xlane.f32.xlu0 %v566_v1  ;;  %378 = vmatpush3.bf16.msra.mxu0 %v423_v5  ;;  %v426_v8 = vld [vmem:[#allocation2 + $0x18] sm:$0xff]   ;;  %v427_v9 = vld [vmem:[#allocation2 + $0x20] sm:$0xff]   ;;  %v428_v10 = vld [vmem:[#allocation2 + $0x28] sm:$0xff]  }
  0x28   :  { %65 = vadd.xlane.f32.xlu1 %v63_v3  ;;  %379 = vmatprep.subr.bf16.mxu0 %v495_v0  ;;  %v429_v11 = vld [vmem:[#allocation2 + $0x30] sm:$0xff]   ;;  %v430_v12 = vld [vmem:[#allocation2 + $0x38] sm:$0xff]   ;;  %v431_v13 = vld [vmem:[#allocation4] sm:$0xff]  }
  0x29   :  { %393 = vmatprep.mubr.msk.bf16.mxu0 %vm496_vm0, %v495_v0  ;;  %413 = vmatprep.mubr.msk.bf16.mxu1 %vm496_vm0, %v495_v0  ;;  %v432_v14 = vld [vmem:[#allocation4 + $0x8] sm:$0xff]   ;;  %v433_v15 = vld [vmem:[#allocation4 + $0x10] sm:$0xff]   ;;  %v434_v16 = vld [vmem:[#allocation4 + $0x18] sm:$0xff]  }
  0x2a   :  { %398 = vmatpush3.bf16.msra.mxu1 %v431_v13  ;;  %v435_v17 = vld [vmem:[#allocation4 + $0x20] sm:$0xff]   ;;  %v436_v18 = vld [vmem:[#allocation4 + $0x28] sm:$0xff]   ;;  %v437_v46 = vld [vmem:[#allocation4 + $0x30] sm:$0xff]  }
  0x2b   :  { %59 = vadd.xlane.f32.xlu0 %v571_v2  ;;  %380 = vmatpush3.bf16.msra.mxu0 %v424_v6  ;;  %v339_v36 = vld [vmem:[%s622_s5] ss:$0 sm:$0xff]  ;;  %v438_v47 = vld [vmem:[#allocation4 + $0x38] sm:$0xff]  }
  0x2c   :  { %67 = vadd.xlane.f32.xlu1 %v64_v4  ;;  %381 = vmatprep.subr.bf16.mxu0 %v495_v0  ;;  %v340_v41 = vld [vmem:[%s623_s6] ss:$0 sm:$0xff] }
  0x2d   :  { %399 = vmatprep.subr.bf16.mxu1 %v495_v0  ;;  %v341_v48 = vld [vmem:[%s619_s2] ss:$0 sm:$0xff] }
  0x2e   :  { %400 = vmatpush3.bf16.msra.mxu1 %v432_v14  ;;  %v350_v58 = vld [vmem:[%s621_s4] ss:$0 sm:$0xff] }
  0x2f   :  { %382 = vmatpush3.bf16.msra.mxu0 %v425_v7  ;;  %401 = vmatprep.subr.bf16.mxu1 %v495_v0 }
  0x30   :  { %383 = vmatprep.subr.bf16.mxu0 %v495_v0 }
  0x32   :  { %402 = vmatpush3.bf16.msra.mxu1 %v433_v15 }
  0x33   :  { %384 = vmatpush3.bf16.msra.mxu0 %v426_v8  ;;  %403 = vmatprep.subr.bf16.mxu1 %v495_v0 }
  0x34   :  { %385 = vmatprep.subr.bf16.mxu0 %v495_v0 }
  0x36   :  { %404 = vmatpush3.bf16.msra.mxu1 %v434_v16 }
  0x37   :  { %386 = vmatpush3.bf16.msra.mxu0 %v427_v9  ;;  %405 = vmatprep.subr.bf16.mxu1 %v495_v0 }
  0x38   :  { %387 = vmatprep.subr.bf16.mxu0 %v495_v0 }
  0x3a   :  { %406 = vmatpush3.bf16.msra.mxu1 %v435_v17 }
  0x3b   :  { %388 = vmatpush3.bf16.msra.mxu0 %v428_v10  ;;  %407 = vmatprep.subr.bf16.mxu1 %v495_v0 }
  0x3c   :  { %389 = vmatprep.subr.bf16.mxu0 %v495_v0 }
  0x3e   :  { %408 = vmatpush3.bf16.msra.mxu1 %v436_v18 }
  0x3f   :  { %390 = vmatpush3.bf16.msra.mxu0 %v429_v11  ;;  %409 = vmatprep.subr.bf16.mxu1 %v495_v0 }
  0x40   :  { %391 = vmatprep.subr.bf16.mxu0 %v495_v0 }
  0x42   :  { %410 = vmatpush3.bf16.msra.mxu1 %v437_v46 }
  0x43   :  { %392 = vmatpush3.bf16.msra.mxu0 %v430_v12  ;;  %411 = vmatprep.subr.bf16.mxu1 %v495_v0 }
  0x46   :  { %412 = vmatpush3.bf16.msra.mxu1 %v438_v47 }
  0xb4   :  { %v58_v19 = vpop.xlane.xlu0 %57 }
  0xb5   :  { %v61_v20 = vmul.f32 0.03125, %v58_v19  ;;  %v66_v21 = vpop.xlane.xlu1 %65 }
  0xb6   :  { %v69_v23 = vmul.f32 0.03125, %v66_v21 }
  0xb7   :  { %v71_v22 = vmul.f32 %v61_v20, %v61_v20  ;;  %v75_v33 = vsub.f32 %v566_v1, %v61_v20 }
  0xb8   :  { %v60_v24 = vpop.xlane.xlu0 %59 }
  0xb9   :  { %v73_v25 = vsub.f32 %v69_v23, %v71_v22  ;;  %v62_v26 = vmul.f32 0.03125, %v60_v24  ;;  %v68_v27 = vpop.xlane.xlu1 %67 }
  0xba   :  { %v70_v30 = vmul.f32 0.03125, %v68_v27 }
  0xbb   :  { %v77_v28 = vadd.f32 1e-06, %v73_v25  ;;  %v72_v29 = vmul.f32 %v62_v26, %v62_v26  ;;  %v76_v37 = vsub.f32 %v571_v2, %v62_v26 }
  0xbd   :  { %439 = vrsqrt.f32 %v77_v28  ;;  %v74_v31 = vsub.f32 %v70_v30, %v72_v29 }
  0xbf   :  { %v78_v32 = vadd.f32 1e-06, %v74_v31 }
  0xc1   :  { %441 = vrsqrt.f32 %v78_v32 }
  0xc7   :  { %v440_v34 = vpop.eup %439 }
  0xc8   :  { %v81_v35 = vmul.f32 %v440_v34, %v75_v33 }
  0xca   :  { %v90_v40 = vmul.f32 %v339_v36, %v81_v35 }
  0xcb   :  { %v442_v38 = vpop.eup %441 }
  0xcc   :  { %v82_v39 = vmul.f32 %v442_v38, %v76_v37  ;;  %v99_v43 = vadd.f32 %v340_v41, %v90_v40 }
  0xce   :  { %v91_v42 = vmul.f32 %v339_v36, %v82_v39 }
  0xd0   :  { %v100_v44 = vadd.f32 %v340_v41, %v91_v42 }
  0xd2   :  { %v101_v45 = vpack.c.bf16 %v100_v44, %v99_v43 }
  0xd4   :  { %394 = vmatmul.mubr.bf16.vlgmr.msra.gmra.mrb[0].mxu0 %v101_v45 }
 0x1a7   :  { %v207_v49 = vpop.f32.mrb[0].mxu0 }
 0x1a8   :  { %v208_v50 = vadd.f32 %v341_v48, %v207_v49  ;;  %v395_v51 = vpop.f32.mrb[1].mxu0 }
 0x1a9   :  { %v210_v52 = vpop.f32.mrb[2].mxu0 }
 0x1aa   :  { %v211_v53 = vadd.f32 %v341_v48, %v210_v52  ;;  %v396_v54 = vpop.f32.mrb[3].mxu0  ;;  %v214_v55 = vmax.f32 %v208_v50, 0.0 }
 0x1ac   :  { %v215_v56 = vmax.f32 %v211_v53, 0.0 }
 0x1ae   :  { %v216_v57 = vpack.c.bf16 %v215_v56, %v214_v55 }
 0x1b0   :  { %414 = vmatmul.mubr.bf16.vlgmr.msra.gmra.mrb[0].mxu1 %v216_v57 }
 0x283   :  { %v322_v59 = vpop.f32.mrb[0].mxu1 }
 0x284   :  { %v323_v60 = vadd.f32 %v350_v58, %v322_v59  ;;  %v415_v61 = vpop.f32.mrb[1].mxu1 }
 0x285   :  { %v325_v62 = vpop.f32.mrb[2].mxu1 }
 0x286   :  { %v329_v63 = vadd.f32 %v323_v60, %v566_v1  ;;  %v326_v0 = vadd.f32 %v350_v58, %v325_v62  ;;  %v416_v3 = vpop.f32.mrb[3].mxu1 }
 0x288   :  { %331 = vst [vmem:[%s624_s7] sm:$0xff] %v329_v63  ;;  %v330_v4 = vadd.f32 %v326_v0, %v571_v2 }
 0x28a   :  { %332 = vst [vmem:[%s624_s7 + $0x8] sm:$0xff] %v330_v4 }
 0x28b   :  { %337 = vsyncpa [#allocation3], 1 }
 0x28c   :  { %338 = vsyncpa [#allocation5], 1 }

</bundles_post_ra>
